<compile_context>
chip_gen: v5e
topology: v5e:2x2
jax: 0.10.0
libtpu: 0.0.40
codegen_flags: <defaults>
</compile_context>

<pallas_src>
import functools

import jax
import jax.numpy as jnp
from jax.experimental import pallas as pl
from jax.experimental.pallas import tpu as pltpu

_LANE = 128   # lane width: feature/hidden axes padded to this (dense vst + MXU alignment)


def _round_up(x: int, m: int) -> int:
    return ((x + m - 1) // m) * m


def _cdiv(a: int, b: int) -> int:
    return -(-a // b)


def _tpu_topology():
    """(vmem_capacity_bytes, tensorcores_per_chip) with conservative fallbacks."""
    vmem_bytes = 128 << 20
    cores = 1
    try:
        info = pltpu.get_tpu_info()
        vmem_bytes = int(getattr(info, "vmem_capacity_bytes", vmem_bytes))
    except Exception:
        pass
    try:
        kind = jax.devices()[0].device_kind.lower()
        if "7" in kind:          # v7x: 2 TensorCores per chip
            cores = 2
    except Exception:
        pass
    return vmem_bytes, cores


def _pad2(a, rows, cols, dtype):
    """Cast to dtype and zero-pad a 2D array up to (rows, cols) iff needed."""
    a = a.astype(dtype)
    if a.shape == (rows, cols):
        return a
    return jnp.pad(a, ((0, rows - a.shape[0]), (0, cols - a.shape[1])))


def _double_layer_kernel(x_ref, we_ref, be_ref, wd_ref, bd_ref, z_ref, r_ref,
                         *, apply_act: bool):
    # ---- encoder: z = act(x @ W_enc + b_enc) ------------------------------
    # Operands are (optionally) bf16; accumulate in f32 on the MXU.
    z = jnp.dot(x_ref[...], we_ref[...], preferred_element_type=jnp.float32)
    z = z + be_ref[...]                      # (TB, Hp) + (1, Hp), f32 epilogue
    if apply_act:
        z = jnp.tanh(z)                      # EUP
    z_ref[...] = z.astype(z_ref.dtype)       # lane-dense (Hp % 128 == 0) store

    # ---- decoder: recons = act(z @ W_dec + b_dec) -------------------------
    zc = z.astype(wd_ref.dtype)              # bf16 for the second MXU pass
    r = jnp.dot(zc, wd_ref[...], preferred_element_type=jnp.float32)
    r = r + bd_ref[...]                      # (TB, Dp) + (1, Dp), f32 epilogue
    if apply_act:
        r = jnp.tanh(r)
    r_ref[...] = r.astype(r_ref.dtype)       # lane-dense (Dp % 128 == 0) store


def pretrain_double_layer_forward(x, w_enc, b_enc, w_dec, b_dec, *,
                                  act: bool = True,
                                  tile_b: int = 512,
                                  compute_dtype=jnp.bfloat16,
                                  out_dtype=None,
                                  keep_padded: bool = False,
                                  single_buffer_weights: bool = False):
    """x: (B, D); w_enc: (D, H); b_enc: (H,); w_dec: (H, D); b_dec: (D,).

    Returns (z, recons_x) with shapes (B, H), (B, D) in `out_dtype`
    (default: compute_dtype, i.e. bf16).  Use compute_dtype=out_dtype=float32
    for exact PyTorch-f32 semantics."""
    B, D = x.shape
    H = w_enc.shape[1]
    assert w_enc.shape == (D, H) and w_dec.shape == (H, D)
    assert b_enc.shape == (H,) and b_dec.shape == (D,)

    cd = jnp.dtype(compute_dtype)
    od = jnp.dtype(out_dtype) if out_dtype is not None else cd

    # Lane-dense padding of the feature / hidden axes (zero padding is exact:
    # padded x columns are 0, padded weight rows/cols are 0, padded biases are 0).
    Dp = _round_up(D, _LANE)
    Hp = _round_up(H, _LANE)

    vmem_cap_phys, num_cores = _tpu_topology()
    vmem_cap = int(0.85 * vmem_cap_phys)          # never exceed per-TC VMEM (64 MiB on v7x)

    # Sublane granularity of the batch tile: bf16 packs 2 rows per sublane.
    sub = 16 if cd.itemsize == 2 else 8

    # Resident VMEM footprint of weights/biases (x1 if single-buffered, x2 if
    # default double-buffered) and per-row footprint of the pipelined tiles
    # (x2 for double-buffering of x / z / recons).
    wbuf = 1 if single_buffer_weights else 2
    weight_bytes = (Dp * Hp + Hp * Dp) * cd.itemsize + (Hp + Dp) * 4
    per_row_bytes = 2 * (Dp * cd.itemsize + (Hp + Dp) * od.itemsize)

    # ---- batch tile selection ---------------------------------------------
    if B <= sub:
        tb = B                                    # single full-extent block
    else:
        tb = max(sub, min(tile_b, (B // sub) * sub))   # never larger than the array
        # Clamp to the VMEM budget (keeps the x/z/r double-buffers alive).
        usable = vmem_cap - wbuf * weight_bytes
        if usable > 0 and (usable // per_row_bytes) >= sub:
            tb = min(tb, ((usable // per_row_bytes) // sub) * sub)
        # Multi-TensorCore (v7x): make the parallel batch grid an even multiple
        # of the core count so both cores get balanced work.  Single-TC chips
        # (v5e/v6e) keep the minimal number of pipeline steps.
        if num_cores > 1 and B > sub * num_cores:
            steps = _cdiv(B, tb)
            if steps % num_cores != 0:
                steps = _round_up(steps, num_cores)
                tb = max(sub, _round_up(_cdiv(B, steps), sub))
    grid_b = _cdiv(B, tb)

    # ---- operand prep (pad/cast only when actually needed) -----------------
    x_p = x.astype(cd)
    if Dp != D:
        x_p = jnp.pad(x_p, ((0, 0), (0, Dp - D)))
    we_p = _pad2(w_enc, Dp, Hp, cd)
    wd_p = _pad2(w_dec, Hp, Dp, cd)
    be_p = _pad2(b_enc.reshape(1, H), 1, Hp, jnp.float32)
    bd_p = _pad2(b_dec.reshape(1, D), 1, Dp, jnp.float32)

    # Scoped VMEM limit: sized from the actual footprint, >= 32 MiB, and capped
    # by the physical per-TC VMEM (64 MiB on v7x, 128 MiB on v5e/v6e).
    vmem_needed = wbuf * weight_bytes + tb * per_row_bytes
    vmem_limit = int(min(max(int(1.5 * vmem_needed), 32 << 20), vmem_cap))

    def _wspec(shape):
        # Weight / bias blocks have a constant index map (resident across the grid).
        if single_buffer_weights:
            return pl.BlockSpec(shape, lambda i: (0, 0), pipeline_mode=pl.Buffered(1))
        return pl.BlockSpec(shape, lambda i: (0, 0))

    kernel = functools.partial(_double_layer_kernel, apply_act=act)

    grid_spec = pltpu.PrefetchScalarGridSpec(
        num_scalar_prefetch=0,
        grid=(grid_b,),
        in_specs=[
            pl.BlockSpec((tb, Dp), lambda i: (i, 0)),   # x tile (ragged tail masked)
            _wspec((Dp, Hp)),                           # W_enc (resident)
            _wspec((1, Hp)),                            # b_enc
            _wspec((Hp, Dp)),                           # W_dec (resident)
            _wspec((1, Dp)),                            # b_dec
        ],
        out_specs=[
            pl.BlockSpec((tb, Hp), lambda i: (i, 0)),   # z (lane-dense)
            pl.BlockSpec((tb, Dp), lambda i: (i, 0)),   # recons_x (lane-dense)
        ],
    )

    z_p, r_p = pl.pallas_call(
        kernel,
        out_shape=(
            jax.ShapeDtypeStruct((B, Hp), od),
            jax.ShapeDtypeStruct((B, Dp), od),
        ),
        grid_spec=grid_spec,
        compiler_params=pltpu.CompilerParams(
            dimension_semantics=("parallel",),
            vmem_limit_bytes=vmem_limit),
    )(x_p, we_p, be_p, wd_p, bd_p)

    if keep_padded:
        return z_p, r_p
    # Strip feature padding only if it exists (each slice is an extra HBM pass).
    z_out = z_p if Hp == H else z_p[:, :H]
    r_out = r_p if Dp == D else r_p[:, :D]
    return z_out, r_out


def _init_linear(key, fan_in, fan_out):
    """Deterministic init mimicking torch.nn.Linear (uniform +/-1/sqrt(fan_in)).
    Returns weight already transposed to (fan_in, fan_out) and bias (fan_out,)."""
    kw, kb = jax.random.split(key)
    bound = 1.0 / jnp.sqrt(jnp.float32(fan_in))
    w = jax.random.uniform(kw, (fan_in, fan_out), jnp.float32, -bound, bound)
    b = jax.random.uniform(kb, (fan_out,), jnp.float32, -bound, bound)
    return w, b


def reference_forward(x, w_enc, b_enc, w_dec, b_dec, act=True,
                      compute_dtype=jnp.float32):
    cd = jnp.dtype(compute_dtype)
    z = jnp.dot(x.astype(cd), w_enc.astype(cd),
                preferred_element_type=jnp.float32) + b_enc
    if act:
        z = jnp.tanh(z)
    r = jnp.dot(z.astype(cd), w_dec.astype(cd),
                preferred_element_type=jnp.float32) + b_dec
    if act:
        r = jnp.tanh(r)
    return z, r


if __name__ == "__main__":
    key = jax.random.PRNGKey(0)
    k_x, k_enc, k_dec = jax.random.split(key, 3)

    # In the PyTorch module: enc = Linear(X.shape[0], dim), dec = Linear(dim, X.shape[0]);
    # a forward batch is (batch, in_dim).  Batch is deliberately ragged to exercise the
    # masked last-block path (no batch padding in HBM anymore).
    batch, in_dim, hidden = 300, 64, 32

    x = jax.random.normal(k_x, (batch, in_dim), jnp.float32)
    w_enc, b_enc = _init_linear(k_enc, in_dim, hidden)   # enc: Linear(in_dim, hidden)
    w_dec, b_dec = _init_linear(k_dec, hidden, in_dim)   # dec: Linear(hidden, in_dim)

    # Default fast path: bf16 operands + bf16 outputs, f32 MXU accumulation.
    z, recons = pretrain_double_layer_forward(x, w_enc, b_enc, w_dec, b_dec, act=True)
    z, recons = jax.block_until_ready((z, recons))
    assert z.shape == (batch, hidden) and recons.shape == (batch, in_dim)
    z32 = jnp.asarray(z, jnp.float32)
    r32 = jnp.asarray(recons, jnp.float32)

    # Matched-precision reference (bf16 operands, f32 accumulation).
    z_m, r_m = reference_forward(x, w_enc, b_enc, w_dec, b_dec, act=True,
                                 compute_dtype=jnp.bfloat16)
    assert jnp.allclose(z32, z_m, atol=2e-2, rtol=2e-2)
    assert jnp.allclose(r32, r_m, atol=2e-2, rtol=2e-2)

    # Full-f32 reference: loose check (bounds the bf16 operand/output rounding).
    z_f, r_f = reference_forward(x, w_enc, b_enc, w_dec, b_dec, act=True,
                                 compute_dtype=jnp.float32)
    assert jnp.allclose(z32, z_f, atol=5e-2, rtol=5e-2)
    assert jnp.allclose(r32, r_f, atol=5e-2, rtol=5e-2)

    # Exact-semantics opt-in path (f32 operands + f32 outputs), matches PyTorch f32.
    z_e, r_e = pretrain_double_layer_forward(x, w_enc, b_enc, w_dec, b_dec, act=True,
                                             compute_dtype=jnp.float32,
                                             out_dtype=jnp.float32)
    z_e, r_e = jax.block_until_ready((z_e, r_e))
    assert jnp.allclose(z_e, z_f, atol=2e-2, rtol=2e-2)
    assert jnp.allclose(r_e, r_f, atol=2e-2, rtol=2e-2)

    print("KERNEL_OK")
</pallas_src>

<mosaic_0001>
module attributes {stable_mosaic.version = 11 : i64} {
  func.func @_double_layer_kernel(%arg0: i32, %arg1: memref<288x128xbf16, #tpu.memory_space<vmem>>, %arg2: memref<128x128xbf16, #tpu.memory_space<vmem>>, %arg3: memref<1x128xf32, #tpu.memory_space<vmem>>, %arg4: memref<128x128xbf16, #tpu.memory_space<vmem>>, %arg5: memref<1x128xf32, #tpu.memory_space<vmem>>, %arg6: memref<288x128xbf16, #tpu.memory_space<vmem>>, %arg7: memref<288x128xbf16, #tpu.memory_space<vmem>>) attributes {dimension_semantics = [#tpu.dimension_semantics<parallel>], iteration_bounds = array<i64: 2>, scalar_prefetch = 0 : i64, scratch_operands = 0 : i64, tpu.core_type = #tpu.core_type<tc>, window_params = [{transform_indices = @transform_0, window_bounds = array<i64: 288, 128>}, {pipeline_mode = #tpu.pipeline_mode<synchronous>, transform_indices = @transform_1, window_bounds = array<i64: 128, 128>}, {pipeline_mode = #tpu.pipeline_mode<synchronous>, transform_indices = @transform_2, window_bounds = array<i64: 1, 128>}, {pipeline_mode = #tpu.pipeline_mode<synchronous>, transform_indices = @transform_3, window_bounds = array<i64: 128, 128>}, {pipeline_mode = #tpu.pipeline_mode<synchronous>, transform_indices = @transform_4, window_bounds = array<i64: 1, 128>}, {transform_indices = @transform_5, window_bounds = array<i64: 288, 128>}, {transform_indices = @transform_6, window_bounds = array<i64: 288, 128>}]} {
    %c0 = arith.constant 0 : index
    %c0_0 = arith.constant 0 : index
    %0 = vector.load %arg1[%c0, %c0_0] : memref<288x128xbf16, #tpu.memory_space<vmem>>, vector<288x128xbf16>
    %c0_1 = arith.constant 0 : index
    %c0_2 = arith.constant 0 : index
    %1 = vector.load %arg2[%c0_1, %c0_2] : memref<128x128xbf16, #tpu.memory_space<vmem>>, vector<128x128xbf16>
    %cst = arith.constant dense<0.000000e+00> : vector<288x128xf32>
    %2 = tpu.matmul %0, %1, %cst {dimension_numbers = #tpu.dot_dimension_numbers<[1], [0], [0], [1], [0, 0, 1, 1], [], []>} : vector<288x128xbf16>, vector<128x128xbf16>, vector<288x128xf32> -> vector<288x128xf32>
    %c0_3 = arith.constant 0 : index
    %c0_4 = arith.constant 0 : index
    %3 = vector.load %arg3[%c0_3, %c0_4] : memref<1x128xf32, #tpu.memory_space<vmem>>, vector<1x128xf32>
    %4 = vector.broadcast %3 : vector<1x128xf32> to vector<288x128xf32>
    %5 = arith.addf %2, %4 : vector<288x128xf32>
    %6 = math.tanh %5 : vector<288x128xf32>
    %7 = arith.truncf %6 : vector<288x128xf32> to vector<288x128xbf16>
    %c0_5 = arith.constant 0 : index
    %c0_6 = arith.constant 0 : index
    %8 = vector.load %arg6[%c0_5, %c0_6] : memref<288x128xbf16, #tpu.memory_space<vmem>>, vector<288x128xbf16>
    tpu.vector_store %arg6[%c0_5, %c0_6], %7 {strides = array<i32>} : memref<288x128xbf16, #tpu.memory_space<vmem>>, vector<288x128xbf16>,
    %9 = arith.truncf %6 : vector<288x128xf32> to vector<288x128xbf16>
    %c0_7 = arith.constant 0 : index
    %c0_8 = arith.constant 0 : index
    %10 = vector.load %arg4[%c0_7, %c0_8] : memref<128x128xbf16, #tpu.memory_space<vmem>>, vector<128x128xbf16>
    %cst_9 = arith.constant dense<0.000000e+00> : vector<288x128xf32>
    %11 = tpu.matmul %9, %10, %cst_9 {dimension_numbers = #tpu.dot_dimension_numbers<[1], [0], [0], [1], [0, 0, 1, 1], [], []>} : vector<288x128xbf16>, vector<128x128xbf16>, vector<288x128xf32> -> vector<288x128xf32>
    %c0_10 = arith.constant 0 : index
    %c0_11 = arith.constant 0 : index
    %12 = vector.load %arg5[%c0_10, %c0_11] : memref<1x128xf32, #tpu.memory_space<vmem>>, vector<1x128xf32>
    %13 = vector.broadcast %12 : vector<1x128xf32> to vector<288x128xf32>
    %14 = arith.addf %11, %13 : vector<288x128xf32>
    %15 = math.tanh %14 : vector<288x128xf32>
    %16 = arith.truncf %15 : vector<288x128xf32> to vector<288x128xbf16>
    %c0_12 = arith.constant 0 : index
    %c0_13 = arith.constant 0 : index
    %17 = vector.load %arg7[%c0_12, %c0_13] : memref<288x128xbf16, #tpu.memory_space<vmem>>, vector<288x128xbf16>
    tpu.vector_store %arg7[%c0_12, %c0_13], %16 {strides = array<i32>} : memref<288x128xbf16, #tpu.memory_space<vmem>>, vector<288x128xbf16>,
    return
  }
  func.func @transform_0(%arg0: i32) -> (i32, i32) {
    %c0_i32 = arith.constant 0 : i32
    %c0_i32_0 = arith.constant 0 : i32
    return %arg0, %c0_i32 : i32, i32
  }
  func.func @transform_1(%arg0: i32) -> (i32, i32) {
    %c0_i32 = arith.constant 0 : i32
    %c0_i32_0 = arith.constant 0 : i32
    %c0_i32_1 = arith.constant 0 : i32
    return %c0_i32, %c0_i32_0 : i32, i32
  }
  func.func @transform_2(%arg0: i32) -> (i32, i32) {
    %c0_i32 = arith.constant 0 : i32
    %c0_i32_0 = arith.constant 0 : i32
    %c0_i32_1 = arith.constant 0 : i32
    return %c0_i32, %c0_i32_0 : i32, i32
  }
  func.func @transform_3(%arg0: i32) -> (i32, i32) {
    %c0_i32 = arith.constant 0 : i32
    %c0_i32_0 = arith.constant 0 : i32
    %c0_i32_1 = arith.constant 0 : i32
    return %c0_i32, %c0_i32_0 : i32, i32
  }
  func.func @transform_4(%arg0: i32) -> (i32, i32) {
    %c0_i32 = arith.constant 0 : i32
    %c0_i32_0 = arith.constant 0 : i32
    %c0_i32_1 = arith.constant 0 : i32
    return %c0_i32, %c0_i32_0 : i32, i32
  }
  func.func @transform_5(%arg0: i32) -> (i32, i32) {
    %c0_i32 = arith.constant 0 : i32
    %c0_i32_0 = arith.constant 0 : i32
    return %arg0, %c0_i32 : i32, i32
  }
  func.func @transform_6(%arg0: i32) -> (i32, i32) {
    %c0_i32 = arith.constant 0 : i32
    %c0_i32_0 = arith.constant 0 : i32
    return %arg0, %c0_i32 : i32, i32
  }
}

</mosaic_0001>

<bundles_post_ra>
// kernel: tpu_custom_call.1
= control target key start
LH: loop header
LB: loop body
LE: loop exit
PB: predicated region body
PF: predicated region fallthrough
CT: control target
= control target key end

     0   :  { %s2632_s0 = inlined_call_operand.hbm [shape: bf16[300,128], index: 0, kind: input, shape index: {}]   ;;  %s2633_s1 = inlined_call_operand.hbm [shape: bf16[128,128], index: 1, kind: input, shape index: {}]   ;;  %s2634_s2 = inlined_call_operand.vmem [shape: f32[1,128], index: 2, kind: input, shape index: {}]   ;;  %s2635_s3 = inlined_call_operand.hbm [shape: bf16[128,128], index: 3, kind: input, shape index: {}]   ;;  %s2636_s4 = inlined_call_operand.vmem [shape: f32[1,128], index: 4, kind: input, shape index: {}]   ;;  %s2637_s5 = inlined_call_operand.hbm [shape: bf16[300,128], index: 5, kind: output, shape index: {0}]   ;;  %s2638_s6 = inlined_call_operand.hbm [shape: bf16[300,128], index: 6, kind: output, shape index: {1}]  }
   0x1   :  { %2642 = sst [smem:[#allocation16_spill]] %s2633_s1 }
   0x2   :  { %2643 = sst [smem:[#allocation17_spill]] %s2635_s3 }
   0x3   :  { %12 = vsyncpa [#allocation3], 0 }
   0x4   :  { %14 = vsyncpa [#allocation3 + $0x1], 0 }
   0x5   :  { %15 = vsyncpa [#allocation6], 0 }
   0x6   :  { %16 = vsyncpa [#allocation4], 0 }
   0x7   :  { %18 = vsyncpa [#allocation4 + $0x1], 0 }
   0x8   :  { %19 = vsyncpa [#allocation10], 0 }
   0x9   :  { %21 = vsyncpa [#allocation10 + $0x1], 0  ;;  %s2238_s21 = smov 0   ;;  %s2240_s22 = smov 0  }
   0xa   :  { %s2242_s23 = smov 0   ;;  %s2244_s24 = smov 0  }
   0xb LB: > { %s2259_s25 = sadd.s32 4294967295, %s2188_s24   ;;  %s1317_s26 = sadd.s32 4294967294, %s2188_s24   ;;  %s2188_s24 = sphi %s2244_s24, %s2666_s24   ;;  %s2184_s23 = sphi %s2242_s23, %s2665_s23   ;;  %s2180_s22 = sphi %s2240_s22, %s2664_s22   ;;  %s2176_s21 = sphi %s2238_s21, %s2663_s21  }
   0xc   : > { %s2263_s27 = sadd.s32 1, %s2188_s24   ;;  %s34_s28 = sadd.s32 1, %s2184_s23 }
   0xd   : > { %s31_s29 = ssub.s32 %s2188_s24, %s2263_s27  ;;  %p41_p0 = scmp.ne.s32.totalorder %s2184_s23, %s2180_s22 }
   0xe   : > { %p32_p1 = scmp.eq.s32.totalorder %s31_s29, 0  ;;  %p42_p2 = scmp.eq.s32.totalorder %s2188_s24, 0 }
   0xf   : > { %p47_p3 = scmp.ne.s32.totalorder %s2180_s22, %s2176_s21  ;;  %p2640_p4 = scmp.eq.s32.totalorder %s2259_s25, 0 }
  0x10   : > { %s2275_s30 = scalar_select %p32_p1, %s2184_s23, %s34_s28  }
  0x11   : > { %p2277_p5 = por %p42_p2, %p41_p0  ;;  %p2283_p6 = por %p2640_p4, %p47_p3 }
  0x12   : > { %2644 = sst [smem:[#allocation15_spill]] %s2275_s30  ;;  %p155_p7 = scmp.eq.s32.totalorder %s2259_s25, 1 }
  0x13   : > { %p161_p8 = scmp.eq.s32.totalorder %s1317_s26, 1  ;;  %p1318_p9 = scmp.ge.s32.totalorder %s2188_s24, 1 }
  0x14   : > { %p194_p10 = scmp.lt.s32.totalorder %s2188_s24, 3  ;;  %p2290_p11 = por %p155_p7, %p41_p0 }
  0x15   : > { %p2294_p12 = por %p161_p8, %p47_p3  ;;  %s2650_s1 = sld [smem:[#allocation16_spill]] }
  0x16   : > { %p2298_p13 = pnand %p1318_p9, %p194_p10  ;;  %s2190_s15 = smov [#allocation5]  }
  0x17   : > { %s2648_s10 = scalar_select %p2294_p12, 1, 0 }
  0x18   : > { %p1758_p1 = pneg %p2298_p13  ;;  %s207_s16 = sshll.u32 %s2190_s15, 4  ;;  %s208_s16 = int_to_ptr.vmem [resolvable:$true] %s207_s16 }
  0x19   : > { %s2651_s3 = sld [smem:[#allocation17_spill]]  ;;  %s2191_s20 = smov 64  }
  0x1a   : > { %p1759_p0 = pnand %p1758_p1, %p2640_p4  ;;  %s2192_s26 = smov 4  }
  0x1b   : > { %s205_s14 = sshll.u32 %s2650_s1, 4  ;;  %s2193_s28 = smov [#allocation7]   ;;  %s206_s14 = int_to_ptr.hbm [resolvable:$true] %s205_s14 }
  0x1c   : > { %1761 = dma.hbm_to_vmem [thread:$0]  (!%p1759_p0), %s206_s14, 1024, %s208_s16, [#allocation6], %s2191_s20, %s2191_s20, %s2192_s26  }
  0x1d   : > { %s224_s29 = sshll.u32 %s2193_s28, 4  ;;  %p2639_p2 = scmp.ge.s32.totalorder %s2188_s24, 2  ;;  %s225_s29 = int_to_ptr.vmem [resolvable:$true] %s224_s29 }
  0x1f   : > { %s222_s19 = sshll.u32 %s2651_s3, 4  ;;  %237 = sbr.rel (%p2639_p2) target bundleno = 74 (0x4a), region = 32  ;;  %s223_s19 = int_to_ptr.hbm [resolvable:$true] %s222_s19 }
  0x20   : > { %1764 = dma.hbm_to_vmem [thread:$0]  (!%p1759_p0), %s223_s19, 1024, %s225_s29, [#allocation6], %s2191_s20, %s2191_s20, %s2192_s26  }
  0x24   : > { %240 = sbr.rel (!%p2277_p5) target bundleno = 74 (0x4a), region = 36  ;;  %s241_s12 = sand.u32 (%p2277_p5), 1, %s2184_s23  }
  0x25   : > { %s246_s13 = smul.u32 (%p2277_p5), 36, %s2188_s24  ;;  %s2322_s19 = scalar_lea.sflag (%p2277_p5), [#allocation3], %s241_s12 }
  0x26   : > { %s1745_s15 = smul.u32 (%p2277_p5), 144, %s241_s12 }
  0x27   : > { %s247_s17 = ssub.s32 (%p2277_p5), 38, %s246_s13 }
  0x28   : > { %p248_p3 = scmp.lt.s32.totalorder (%p2277_p5), %s247_s17, 36  ;;  %s245_s20 = scalar_lea.vmem (%p2277_p5), [#allocation2], %s1745_s15 }
  0x2a   : > { %s2668_s17 = smov (!%p248_p3, %s247_s17), 36 }
  0x2b   : > { %s1322_s14 = sshll.u32 %s2668_s17, 2 }
  0x2c   : > { %s251_s16 = ssub.s32 144, %s1322_s14 }
  0x2d   : > { %s252_s18 = sshll.u32 %s251_s16, 4 }
  0x2e   : > { %253 = vsyncadd %s2322_s19, %s252_s18  ;;  %p2325_p5 = scmp.ne.s32.totalorder %s1322_s14, 0  ;;  %s1478_s26 = smul.u32 144, %s2188_s24 }
  0x2f   : > { %s2330_s28 = sshll.u32 %s245_s20, 4  ;;  %s1326_s29 = sshll.u32 %s2668_s17, 6  ;;  %s261_s28 = int_to_ptr.vmem [resolvable:$true] %s2330_s28 }
  0x30   : > { %s256_s12 = scalar_lea.hbm %s2632_s0, %s1478_s26  ;;  %s2027_s14 = sshrl.u32 %s1326_s29, 4 }
  0x31   : > { %s258_s15 = sshll.u32 %s256_s12, 4  ;;  %s2036_s30 = scalar_lea.hbm %s2632_s0, 152  ;;  %s2337_s15 = int_to_ptr.hbm [resolvable:$true] %s258_s15 }
  0x32   : > { %s2025_s18 = sshra.s32 %s2337_s15, 4  ;;  %s2026_s18 = int_to_ptr.hbm [resolvable:$true] %s2025_s18 }
  0x33   : > { %s2032_s1 = scalar_lea.hbm %s2026_s18, %s2027_s14  ;;  %p2037_p10 = scmp.lt.s32.totalorder %s2026_s18, %s2632_s0 }
  0x34   : > { %p2033_p7 = scmp.ne.s32.totalorder %s2026_s18, %s2032_s1  ;;  %p2038_p1 = scmp.lt.s32.totalorder %s2036_s30, %s2032_s1 }
  0x36   : > { %p2034_p8 = pnand %p2033_p7, %p2325_p5  ;;  %p2039_p0 = por %p2038_p1, %p2037_p10 }
  0x38   : > { %p2035_p9 = pneg %p2034_p8 }
  0x3a   : > { %p2040_p3 = pnand %p2039_p0, %p2035_p9 }
  0x3c   : > { %2043 = shalt.err (!%p2040_p3)
}
  0x3d   : > { %s2044_s16 = sshra.s32 %s261_s28, 4  ;;  %s2194_s3 = smov [#allocation2]   ;;  %s2045_s16 = int_to_ptr.vmem [resolvable:$true] %s2044_s16 }
  0x3e   : > { %s2051_s12 = scalar_lea.vmem %s2045_s16, %s2027_s14  ;;  %s2055_s20 = scalar_lea.vmem %s2194_s3, 288 }
  0x3f   : > { %p2052_p7 = scmp.ne.s32.totalorder %s2045_s16, %s2051_s12  ;;  %p2057_p4 = scmp.lt.s32.totalorder %s2055_s20, %s2051_s12 }
  0x41   : > { %p2053_p8 = pnand %p2052_p7, %p2325_p5 }
  0x43   : > { %p2054_p2 = pneg %p2053_p8 }
  0x45   : > { %p2059_p12 = pnand %p2057_p4, %p2054_p2 }
  0x47   : > { %2062 = shalt.err (!%p2059_p12)
}
  0x48   : > { %s2195_s18 = smov 64   ;;  %s2196_s1 = smov 4  }
  0x49   : > { %266 = dma.hbm_to_vmem [thread:$0]  (%p2325_p5), %s2337_s15, %s1326_s29, %s261_s28, %s2322_s19, %s2195_s18, %s2195_s18, %s2196_s1  }
  0x4a PF: > { %272 = sbr.rel (%p2298_p13) target bundleno = 620 (0x26c), region = 40  ;;  %s2365_s30 = sand.u32 (!%p2298_p13), 1, %s2180_s22  }
  0x4b   : > { %s2368_s14 = smul.u32 (!%p2298_p13), 144, %s2365_s30  ;;  %s275_s13 = scalar_lea.sflag (!%p2298_p13), [#allocation3], %s2365_s30 }
  0x4d   : > { %s2372_s26 = scalar_lea.vmem (!%p2298_p13), [#allocation2], %s2368_s14 }
  0x4f   : > { %2159 = dma.done.wait (%p2283_p6), %s275_s13, 2304  }
  0x50   : > { %2161 = vsyncadd (%p2283_p6), %s275_s13, 4294964992  ;;  %p2653_p4 = scmp.eq.s32.totalorder %s2259_s25, 0 }
  0x52   : > { %2163 = dma.done.wait (%p2653_p4), [#allocation6], 2048   ;;  %p2654_p12 = pmov %p2653_p4 }
  0x53   : > { %v1504_v0 = vld [vmem:[#allocation5 + $0x38] sm:$0xff]  ;;  %v1503_v1 = vld [vmem:[#allocation5 + $0x30] sm:$0xff]  ;;  %v1502_v2 = vld [vmem:[#allocation5 + $0x28] sm:$0xff]  ;;  %s2411_s17 = scalar_lea.vmem [#allocation8], %s2368_s14  ;;  %s2471_s28 = scalar_lea.vmem [#allocation9], %s2368_s14 }
  0x54   : > { %2165 = vsyncadd (%p2654_p12), [#allocation6], 4294965248  ;;  %550 = vmatpush.bf16.msra.mxu0 %v1504_v0  ;;  %1729 = vmatpush.bf16.msra.mxu2 %v1504_v0  ;;  %v1501_v3 = vld [vmem:[#allocation5 + $0x20] sm:$0xff]  ;;  %v1500_v4 = vld [vmem:[#allocation5 + $0x18] sm:$0xff]  ;;  %s1141_s29 = scalar_lea.sflag [#allocation4], %s2365_s30  ;;  %s1153_s16 = smul.u32 (%p2290_p11), 36, %s2259_s25 }
  0x55   : > { %v1499_v5 = vld [vmem:[#allocation5 + $0x10] sm:$0xff]  ;;  %v1498_v6 = vld [vmem:[#allocation5 + $0x8] sm:$0xff]  ;;  %v1497_v7 = vld [vmem:[#allocation5] sm:$0xff] }
  0x56   : > { %v1479_v8 = vld [vmem:[%s2372_s26] sm:$0xff]  ;;  %v1488_v9 = vld [vmem:[%s2372_s26 + $0x48] sm:$0xff]  ;;  %v1489_v11 = vld [vmem:[%s2372_s26 + $0x50] sm:$0xff]  ;;  %s1154_s12 = ssub.s32 (%p2290_p11), 38, %s1153_s16 }
  0x57   : > { %v1480_v10 = vld [vmem:[%s2372_s26 + $0x8] sm:$0xff]  ;;  %v1481_v12 = vld [vmem:[%s2372_s26 + $0x10] sm:$0xff]  ;;  %v1490_v13 = vld [vmem:[%s2372_s26 + $0x58] sm:$0xff]  ;;  %p1155_p6 = scmp.lt.s32.totalorder (%p2290_p11), %s1154_s12, 36 }
  0x58   : > { %551 = vmatpush.bf16.msra.mxu0 %v1503_v1  ;;  %1730 = vmatpush.bf16.msra.mxu2 %v1503_v1  ;;  %v1482_v14 = vld [vmem:[%s2372_s26 + $0x18] sm:$0xff]  ;;  %v1491_v15 = vld [vmem:[%s2372_s26 + $0x60] sm:$0xff]  ;;  %v1492_v17 = vld [vmem:[%s2372_s26 + $0x68] sm:$0xff] }
  0x59   : > { %v1483_v16 = vld [vmem:[%s2372_s26 + $0x20] sm:$0xff]  ;;  %v1484_v18 = vld [vmem:[%s2372_s26 + $0x28] sm:$0xff]  ;;  %v1493_v19 = vld [vmem:[%s2372_s26 + $0x70] sm:$0xff] }
  0x5a   : > { %v1512_v20 = vld [vmem:[#allocation7 + $0x38] sm:$0xff]  ;;  %v1511_v21 = vld [vmem:[#allocation7 + $0x30] sm:$0xff]  ;;  %v1510_v24 = vld [vmem:[#allocation7 + $0x28] sm:$0xff] }
  0x5b   : > { %933 = vmatpush.bf16.msra.mxu1 %v1512_v20  ;;  %1737 = vmatpush.bf16.msra.mxu3 %v1512_v20  ;;  %v1485_v22 = vld [vmem:[%s2372_s26 + $0x30] sm:$0xff]  ;;  %v1494_v23 = vld [vmem:[%s2372_s26 + $0x78] sm:$0xff]  ;;  %v1495_v29 = vld [vmem:[%s2372_s26 + $0x80] sm:$0xff] }
  0x5c   : > { %552 = vmatpush.bf16.msra.mxu0 %v1502_v2  ;;  %1731 = vmatpush.bf16.msra.mxu2 %v1502_v2  ;;  %v1509_v25 = vld [vmem:[#allocation7 + $0x20] sm:$0xff]  ;;  %v1508_v26 = vld [vmem:[#allocation7 + $0x18] sm:$0xff]  ;;  %v1507_v27 = vld [vmem:[#allocation7 + $0x10] sm:$0xff] }
  0x5d   : > { %v1486_v28 = vld [vmem:[%s2372_s26 + $0x38] sm:$0xff]  ;;  %v1505_v31 = vld [vmem:[#allocation7] sm:$0xff]  ;;  %v1496_v34 = vld [vmem:[%s2372_s26 + $0x88] sm:$0xff] }
  0x5e   : > { %v1506_v30 = vld [vmem:[#allocation7 + $0x8] sm:$0xff]  ;;  %v2401_v32 = vld [vmem:[%s2634_s2] ss:$0 sm:$0xff] }
  0x5f   : > { %934 = vmatpush.bf16.msra.mxu1 %v1511_v21  ;;  %1738 = vmatpush.bf16.msra.mxu3 %v1511_v21  ;;  %v1487_v33 = vld [vmem:[%s2372_s26 + $0x40] sm:$0xff] }
  0x60   : > { %553 = vmatpush.bf16.msra.mxu0 %v1501_v3  ;;  %1732 = vmatpush.bf16.msra.mxu2 %v1501_v3 }
  0x63   : > { %935 = vmatpush.bf16.msra.mxu1 %v1510_v24  ;;  %1739 = vmatpush.bf16.msra.mxu3 %v1510_v24 }
  0x64   : > { %554 = vmatpush.bf16.msra.mxu0 %v1500_v4  ;;  %1733 = vmatpush.bf16.msra.mxu2 %v1500_v4 }
  0x67   : > { %936 = vmatpush.bf16.msra.mxu1 %v1509_v25  ;;  %1740 = vmatpush.bf16.msra.mxu3 %v1509_v25 }
  0x68   : > { %555 = vmatpush.bf16.msra.mxu0 %v1499_v5  ;;  %1734 = vmatpush.bf16.msra.mxu2 %v1499_v5 }
  0x6b   : > { %937 = vmatpush.bf16.msra.mxu1 %v1508_v26  ;;  %1741 = vmatpush.bf16.msra.mxu3 %v1508_v26 }
  0x6c   : > { %556 = vmatpush.bf16.msra.mxu0 %v1498_v6  ;;  %1735 = vmatpush.bf16.msra.mxu2 %v1498_v6 }
  0x6f   : > { %938 = vmatpush.bf16.msra.mxu1 %v1507_v27  ;;  %1742 = vmatpush.bf16.msra.mxu3 %v1507_v27 }
  0x70   : > { %557 = vmatpush.bf16.msra.mxu0 %v1497_v7  ;;  %1736 = vmatpush.bf16.msra.mxu2 %v1497_v7 }
  0x73   : > { %558 = vmatmul.bf16.vlgmr.msra.gmra.mxu0 %v1479_v8  ;;  %603 = vmatmul.bf16.vlgmr.msra.gmra.mxu2 %v1488_v9 }
  0x74   : > { %939 = vmatpush.bf16.msra.mxu1 %v1506_v30  ;;  %1743 = vmatpush.bf16.msra.mxu3 %v1506_v30 }
  0x78   : > { %940 = vmatpush.bf16.msra.mxu1 %v1505_v31  ;;  %1744 = vmatpush.bf16.msra.mxu3 %v1505_v31 }
  0x83   : > { %563 = vmatmul.bf16.gmra.mxu0 %v1480_v10  ;;  %608 = vmatmul.bf16.gmra.mxu2 %v1489_v11 }
  0x93   : > { %568 = vmatmul.bf16.gmra.mxu0 %v1481_v12  ;;  %613 = vmatmul.bf16.gmra.mxu2 %v1490_v13 }
  0xa3   : > { %573 = vmatmul.bf16.gmra.mxu0 %v1482_v14  ;;  %618 = vmatmul.bf16.gmra.mxu2 %v1491_v15 }
  0xb3   : > { %578 = vmatmul.bf16.gmra.mxu0 %v1483_v16  ;;  %623 = vmatmul.bf16.gmra.mxu2 %v1492_v17 }
  0xc3   : > { %583 = vmatmul.bf16.gmra.mxu0 %v1484_v18  ;;  %628 = vmatmul.bf16.gmra.mxu2 %v1493_v19 }
  0xd3   : > { %588 = vmatmul.bf16.gmra.mxu0 %v1485_v22  ;;  %633 = vmatmul.bf16.gmra.mxu2 %v1494_v23 }
  0xe3   : > { %593 = vmatmul.bf16.gmra.mxu0 %v1486_v28  ;;  %638 = vmatmul.bf16.gmra.mxu2 %v1495_v29 }
  0xf0   : > { %v559_v35 = vpop.f32.mrf.mxu0 }
  0xf1   : > { %v560_v36 = vadd.f32 %v2401_v32, %v559_v35 }
  0xf3   : > { %598 = vmatmul.bf16.gmra.mxu0 %v1487_v33  ;;  %643 = vmatmul.bf16.gmra.mxu2 %v1496_v34  ;;  %1821 = vtanh.f32 %v560_v36 }
  0xf6   : > { %v604_v37 = vpop.f32.mrf.mxu2 }
  0xf7   : > { %v605_v39 = vadd.f32 %v2401_v32, %v604_v37 }
  0xf8   : > { %v561_v38 = vpop.f32.mrf.mxu0 }
  0xf9   : > { %v562_v40 = vadd.f32 %v2401_v32, %v561_v38  ;;  %v1822_v41 = vpop.eup %1821 }
  0xfa   : > { %v685_v43 = vpack.c.bf16 %v1822_v41, %v1822_v41 }
  0xfb   : > { %1823 = vtanh.f32 %v562_v40 }
  0xfc   : > { %1825 = vtanh.f32 %v605_v39  ;;  %v813_v50 = vunpack.c.l.b16 %v685_v43 }
  0xfe   : > { %v606_v42 = vpop.f32.mrf.mxu2 }
  0xff   : > { %v607_v44 = vadd.f32 %v2401_v32, %v606_v42 }
 0x100   : > { %v564_v45 = vpop.f32.mrf.mxu0 }
 0x101   : > { %v1824_v46 = vpop.eup %1823  ;;  %1827 = vtanh.f32 %v607_v44  ;;  %v565_v47 = vadd.f32 %v2401_v32, %v564_v45 }
 0x102   : > { %v1518_v48 = vpack.c.bf16 %v1824_v46, %v1822_v41  ;;  %v686_v49 = vpack.c.bf16 %v1824_v46, %v1824_v46  ;;  %v1826_v51 = vpop.eup %1825 }
 0x103   : > { %1829 = vtanh.f32 %v565_v47  ;;  %v703_v55 = vpack.c.bf16 %v1826_v51, %v1826_v51 }
 0x104   : > { %1519 = vst [vmem:[%s2411_s17] sm:$0xff] %v1518_v48   ;;  %v814_v52 = vunpack.c.l.b16 %v686_v49 }
 0x105   : > { %v831_v62 = vunpack.c.l.b16 %v703_v55 }
 0x106   : > { %v609_v53 = vpop.f32.mrf.mxu2  ;;  %v849_v54 = vpack.c.b16 %v814_v52, %v813_v50 }
 0x107   : > { %v1828_v56 = vpop.eup %1827  ;;  %v610_v60 = vadd.f32 %v2401_v32, %v609_v53 }
 0x108   : > { %v1563_v57 = vpack.c.bf16 %v1828_v56, %v1826_v51  ;;  %v566_v58 = vpop.f32.mrf.mxu0  ;;  %941 = vmatmul.bf16.vlgmr.msra.gmra.mxu1 %v849_v54  ;;  %v704_v59 = vpack.c.bf16 %v1828_v56, %v1828_v56 }
 0x109   : > { %v567_v61 = vadd.f32 %v2401_v32, %v566_v58  ;;  %v1830_v0 = vpop.eup %1829 }
 0x10a   : > { %1703 = vst [vmem:[%s2411_s17 + $0x48] sm:$0xff] %v1563_v57   ;;  %v832_v63 = vunpack.c.l.b16 %v704_v59  ;;  %v687_v3 = vpack.c.bf16 %v1830_v0, %v1830_v0 }
 0x10b   : > { %1831 = vtanh.f32 %v567_v61 }
 0x10c   : > { %v858_v1 = vpack.c.b16 %v832_v63, %v831_v62  ;;  %1833 = vtanh.f32 %v610_v60  ;;  %v815_v10 = vunpack.c.l.b16 %v687_v3 }
 0x10e   : > { %v611_v2 = vpop.f32.mrf.mxu2  ;;  %986 = vmatmul.bf16.vlgmr.msra.gmra.mxu3 %v858_v1 }
 0x10f   : > { %v612_v4 = vadd.f32 %v2401_v32, %v611_v2 }
 0x110   : > { %v569_v5 = vpop.f32.mrf.mxu0 }
 0x111   : > { %v1832_v6 = vpop.eup %1831  ;;  %1835 = vtanh.f32 %v612_v4  ;;  %v570_v7 = vadd.f32 %v2401_v32, %v569_v5 }
 0x112   : > { %v1523_v8 = vpack.c.bf16 %v1832_v6, %v1830_v0  ;;  %v688_v9 = vpack.c.bf16 %v1832_v6, %v1832_v6  ;;  %v1834_v11 = vpop.eup %1833 }
 0x113   : > { %1837 = vtanh.f32 %v570_v7  ;;  %v705_v15 = vpack.c.bf16 %v1834_v11, %v1834_v11 }
 0x114   : > { %1695 = vst [vmem:[%s2411_s17 + $0x8] sm:$0xff] %v1523_v8   ;;  %v816_v12 = vunpack.c.l.b16 %v688_v9 }
 0x115   : > { %v833_v22 = vunpack.c.l.b16 %v705_v15 }
 0x116   : > { %v614_v13 = vpop.f32.mrf.mxu2  ;;  %v850_v14 = vpack.c.b16 %v816_v12, %v815_v10 }
 0x117   : > { %v1836_v16 = vpop.eup %1835  ;;  %v615_v20 = vadd.f32 %v2401_v32, %v614_v13 }
 0x118   : > { %v1568_v17 = vpack.c.bf16 %v1836_v16, %v1834_v11  ;;  %v571_v18 = vpop.f32.mrf.mxu0  ;;  %946 = vmatmul.bf16.gmra.mxu1 %v850_v14  ;;  %v706_v19 = vpack.c.bf16 %v1836_v16, %v1836_v16 }
 0x119   : > { %v572_v21 = vadd.f32 %v2401_v32, %v571_v18  ;;  %v1838_v24 = vpop.eup %1837 }
 0x11a   : > { %1704 = vst [vmem:[%s2411_s17 + $0x50] sm:$0xff] %v1568_v17   ;;  %v834_v23 = vunpack.c.l.b16 %v706_v19  ;;  %v689_v27 = vpack.c.bf16 %v1838_v24, %v1838_v24 }
 0x11b   : > { %1839 = vtanh.f32 %v572_v21 }
 0x11c   : > { %v859_v25 = vpack.c.b16 %v834_v23, %v833_v22  ;;  %1841 = vtanh.f32 %v615_v20  ;;  %v817_v35 = vunpack.c.l.b16 %v689_v27 }
 0x11e   : > { %v616_v26 = vpop.f32.mrf.mxu2  ;;  %991 = vmatmul.bf16.gmra.mxu3 %v859_v25 }
 0x11f   : > { %v617_v28 = vadd.f32 %v2401_v32, %v616_v26 }
 0x120   : > { %v574_v29 = vpop.f32.mrf.mxu0 }
 0x121   : > { %v1840_v30 = vpop.eup %1839  ;;  %1843 = vtanh.f32 %v617_v28  ;;  %v575_v31 = vadd.f32 %v2401_v32, %v574_v29 }
 0x122   : > { %v1528_v33 = vpack.c.bf16 %v1840_v30, %v1838_v24  ;;  %v690_v34 = vpack.c.bf16 %v1840_v30, %v1840_v30  ;;  %v1842_v36 = vpop.eup %1841 }
 0x123   : > { %1845 = vtanh.f32 %v575_v31  ;;  %v707_v40 = vpack.c.bf16 %v1842_v36, %v1842_v36 }
 0x124   : > { %1696 = vst [vmem:[%s2411_s17 + $0x10] sm:$0xff] %v1528_v33   ;;  %v818_v37 = vunpack.c.l.b16 %v690_v34 }
 0x125   : > { %v835_v47 = vunpack.c.l.b16 %v707_v40 }
 0x126   : > { %v619_v38 = vpop.f32.mrf.mxu2  ;;  %v851_v39 = vpack.c.b16 %v818_v37, %v817_v35 }
 0x127   : > { %v1844_v41 = vpop.eup %1843  ;;  %v620_v45 = vadd.f32 %v2401_v32, %v619_v38 }
 0x128   : > { %v1573_v42 = vpack.c.bf16 %v1844_v41, %v1842_v36  ;;  %v576_v43 = vpop.f32.mrf.mxu0  ;;  %951 = vmatmul.bf16.gmra.mxu1 %v851_v39  ;;  %v708_v44 = vpack.c.bf16 %v1844_v41, %v1844_v41 }
 0x129   : > { %v577_v46 = vadd.f32 %v2401_v32, %v576_v43  ;;  %v1846_v49 = vpop.eup %1845 }
 0x12a   : > { %1705 = vst [vmem:[%s2411_s17 + $0x58] sm:$0xff] %v1573_v42   ;;  %v836_v48 = vunpack.c.l.b16 %v708_v44  ;;  %v691_v52 = vpack.c.bf16 %v1846_v49, %v1846_v49 }
 0x12b   : > { %1847 = vtanh.f32 %v577_v46 }
 0x12c   : > { %v860_v50 = vpack.c.b16 %v836_v48, %v835_v47  ;;  %1849 = vtanh.f32 %v620_v45  ;;  %v819_v59 = vunpack.c.l.b16 %v691_v52 }
 0x12e   : > { %v621_v51 = vpop.f32.mrf.mxu2  ;;  %996 = vmatmul.bf16.gmra.mxu3 %v860_v50 }
 0x12f   : > { %v622_v53 = vadd.f32 %v2401_v32, %v621_v51 }
 0x130   : > { %v579_v54 = vpop.f32.mrf.mxu0 }
 0x131   : > { %v1848_v55 = vpop.eup %1847  ;;  %1851 = vtanh.f32 %v622_v53  ;;  %v580_v56 = vadd.f32 %v2401_v32, %v579_v54 }
 0x132   : > { %v1533_v57 = vpack.c.bf16 %v1848_v55, %v1846_v49  ;;  %v692_v58 = vpack.c.bf16 %v1848_v55, %v1848_v55  ;;  %v1850_v60 = vpop.eup %1849 }
 0x133   : > { %1853 = vtanh.f32 %v580_v56  ;;  %v709_v0 = vpack.c.bf16 %v1850_v60, %v1850_v60 }
 0x134   : > { %1697 = vst [vmem:[%s2411_s17 + $0x18] sm:$0xff] %v1533_v57   ;;  %v820_v61 = vunpack.c.l.b16 %v692_v58 }
 0x135   : > { %v837_v7 = vunpack.c.l.b16 %v709_v0 }
 0x136   : > { %v624_v62 = vpop.f32.mrf.mxu2  ;;  %v852_v63 = vpack.c.b16 %v820_v61, %v819_v59 }
 0x137   : > { %v1852_v1 = vpop.eup %1851  ;;  %v625_v5 = vadd.f32 %v2401_v32, %v624_v62 }
 0x138   : > { %v1578_v2 = vpack.c.bf16 %v1852_v1, %v1850_v60  ;;  %v581_v3 = vpop.f32.mrf.mxu0  ;;  %956 = vmatmul.bf16.gmra.mxu1 %v852_v63  ;;  %v710_v4 = vpack.c.bf16 %v1852_v1, %v1852_v1 }
 0x139   : > { %v582_v6 = vadd.f32 %v2401_v32, %v581_v3  ;;  %v1854_v9 = vpop.eup %1853 }
 0x13a   : > { %1706 = vst [vmem:[%s2411_s17 + $0x60] sm:$0xff] %v1578_v2   ;;  %v838_v8 = vunpack.c.l.b16 %v710_v4  ;;  %v693_v12 = vpack.c.bf16 %v1854_v9, %v1854_v9 }
 0x13b   : > { %1855 = vtanh.f32 %v582_v6 }
 0x13c   : > { %v861_v10 = vpack.c.b16 %v838_v8, %v837_v7  ;;  %1857 = vtanh.f32 %v625_v5  ;;  %v821_v19 = vunpack.c.l.b16 %v693_v12 }
 0x13e   : > { %v626_v11 = vpop.f32.mrf.mxu2  ;;  %1001 = vmatmul.bf16.gmra.mxu3 %v861_v10 }
 0x13f   : > { %v627_v13 = vadd.f32 %v2401_v32, %v626_v11 }
 0x140   : > { %v584_v14 = vpop.f32.mrf.mxu0 }
 0x141   : > { %v1856_v15 = vpop.eup %1855  ;;  %1859 = vtanh.f32 %v627_v13  ;;  %v585_v16 = vadd.f32 %v2401_v32, %v584_v14 }
 0x142   : > { %v1538_v17 = vpack.c.bf16 %v1856_v15, %v1854_v9  ;;  %v694_v18 = vpack.c.bf16 %v1856_v15, %v1856_v15  ;;  %v1858_v20 = vpop.eup %1857 }
 0x143   : > { %1861 = vtanh.f32 %v585_v16  ;;  %v711_v24 = vpack.c.bf16 %v1858_v20, %v1858_v20 }
 0x144   : > { %1698 = vst [vmem:[%s2411_s17 + $0x20] sm:$0xff] %v1538_v17   ;;  %v822_v21 = vunpack.c.l.b16 %v694_v18 }
 0x145   : > { %v839_v31 = vunpack.c.l.b16 %v711_v24 }
 0x146   : > { %v629_v22 = vpop.f32.mrf.mxu2  ;;  %v853_v23 = vpack.c.b16 %v822_v21, %v821_v19 }
 0x147   : > { %v1860_v25 = vpop.eup %1859  ;;  %v630_v29 = vadd.f32 %v2401_v32, %v629_v22 }
 0x148   : > { %v1583_v26 = vpack.c.bf16 %v1860_v25, %v1858_v20  ;;  %v586_v27 = vpop.f32.mrf.mxu0  ;;  %961 = vmatmul.bf16.gmra.mxu1 %v853_v23  ;;  %v712_v28 = vpack.c.bf16 %v1860_v25, %v1860_v25 }
 0x149   : > { %v587_v30 = vadd.f32 %v2401_v32, %v586_v27  ;;  %v1862_v34 = vpop.eup %1861 }
 0x14a   : > { %1707 = vst [vmem:[%s2411_s17 + $0x68] sm:$0xff] %v1583_v26   ;;  %v840_v33 = vunpack.c.l.b16 %v712_v28  ;;  %v695_v37 = vpack.c.bf16 %v1862_v34, %v1862_v34 }
 0x14b   : > { %1863 = vtanh.f32 %v587_v30 }
 0x14c   : > { %v862_v35 = vpack.c.b16 %v840_v33, %v839_v31  ;;  %1865 = vtanh.f32 %v630_v29  ;;  %v823_v44 = vunpack.c.l.b16 %v695_v37 }
 0x14e   : > { %v631_v36 = vpop.f32.mrf.mxu2  ;;  %1006 = vmatmul.bf16.gmra.mxu3 %v862_v35 }
 0x14f   : > { %v632_v38 = vadd.f32 %v2401_v32, %v631_v36 }
 0x150   : > { %v589_v39 = vpop.f32.mrf.mxu0 }
 0x151   : > { %v1864_v40 = vpop.eup %1863  ;;  %1867 = vtanh.f32 %v632_v38  ;;  %v590_v41 = vadd.f32 %v2401_v32, %v589_v39 }
 0x152   : > { %v1543_v42 = vpack.c.bf16 %v1864_v40, %v1862_v34  ;;  %v696_v43 = vpack.c.bf16 %v1864_v40, %v1864_v40  ;;  %v1866_v45 = vpop.eup %1865 }
 0x153   : > { %1869 = vtanh.f32 %v590_v41  ;;  %v713_v49 = vpack.c.bf16 %v1866_v45, %v1866_v45 }
 0x154   : > { %1699 = vst [vmem:[%s2411_s17 + $0x28] sm:$0xff] %v1543_v42   ;;  %v824_v46 = vunpack.c.l.b16 %v696_v43 }
 0x155   : > { %v841_v56 = vunpack.c.l.b16 %v713_v49 }
 0x156   : > { %v634_v47 = vpop.f32.mrf.mxu2  ;;  %v854_v48 = vpack.c.b16 %v824_v46, %v823_v44 }
 0x157   : > { %v1868_v50 = vpop.eup %1867  ;;  %v635_v54 = vadd.f32 %v2401_v32, %v634_v47 }
 0x158   : > { %v1588_v51 = vpack.c.bf16 %v1868_v50, %v1866_v45  ;;  %v591_v52 = vpop.f32.mrf.mxu0  ;;  %966 = vmatmul.bf16.gmra.mxu1 %v854_v48  ;;  %v714_v53 = vpack.c.bf16 %v1868_v50, %v1868_v50 }
 0x159   : > { %v592_v55 = vadd.f32 %v2401_v32, %v591_v52  ;;  %v1870_v58 = vpop.eup %1869 }
 0x15a   : > { %1708 = vst [vmem:[%s2411_s17 + $0x70] sm:$0xff] %v1588_v51   ;;  %v842_v57 = vunpack.c.l.b16 %v714_v53  ;;  %v697_v61 = vpack.c.bf16 %v1870_v58, %v1870_v58 }
 0x15b   : > { %1871 = vtanh.f32 %v592_v55 }
 0x15c   : > { %v863_v59 = vpack.c.b16 %v842_v57, %v841_v56  ;;  %1873 = vtanh.f32 %v635_v54  ;;  %v825_v4 = vunpack.c.l.b16 %v697_v61 }
 0x15e   : > { %v636_v60 = vpop.f32.mrf.mxu2  ;;  %1011 = vmatmul.bf16.gmra.mxu3 %v863_v59 }
 0x15f   : > { %v637_v62 = vadd.f32 %v2401_v32, %v636_v60 }
 0x160   : > { %v594_v63 = vpop.f32.mrf.mxu0 }
 0x161   : > { %v1872_v0 = vpop.eup %1871  ;;  %1875 = vtanh.f32 %v637_v62  ;;  %v595_v1 = vadd.f32 %v2401_v32, %v594_v63 }
 0x162   : > { %v1548_v2 = vpack.c.bf16 %v1872_v0, %v1870_v58  ;;  %v698_v3 = vpack.c.bf16 %v1872_v0, %v1872_v0  ;;  %v1874_v5 = vpop.eup %1873  ;;  %v2464_v58 = vld [vmem:[%s2636_s4] ss:$0 sm:$0xff] }
 0x163   : > { %1877 = vtanh.f32 %v595_v1  ;;  %v715_v9 = vpack.c.bf16 %v1874_v5, %v1874_v5 }
 0x164   : > { %1700 = vst [vmem:[%s2411_s17 + $0x30] sm:$0xff] %v1548_v2   ;;  %v826_v6 = vunpack.c.l.b16 %v698_v3 }
 0x165   : > { %v843_v16 = vunpack.c.l.b16 %v715_v9 }
 0x166   : > { %v639_v7 = vpop.f32.mrf.mxu2  ;;  %v855_v8 = vpack.c.b16 %v826_v6, %v825_v4 }
 0x167   : > { %v1876_v10 = vpop.eup %1875  ;;  %v640_v14 = vadd.f32 %v2401_v32, %v639_v7 }
 0x168   : > { %v1593_v11 = vpack.c.bf16 %v1876_v10, %v1874_v5  ;;  %v596_v12 = vpop.f32.mrf.mxu0  ;;  %971 = vmatmul.bf16.gmra.mxu1 %v855_v8  ;;  %v716_v13 = vpack.c.bf16 %v1876_v10, %v1876_v10 }
 0x169   : > { %v597_v15 = vadd.f32 %v2401_v32, %v596_v12  ;;  %v1878_v18 = vpop.eup %1877 }
 0x16a   : > { %1709 = vst [vmem:[%s2411_s17 + $0x78] sm:$0xff] %v1593_v11   ;;  %v844_v17 = vunpack.c.l.b16 %v716_v13  ;;  %v699_v21 = vpack.c.bf16 %v1878_v18, %v1878_v18 }
 0x16b   : > { %1879 = vtanh.f32 %v597_v15 }
 0x16c   : > { %v864_v19 = vpack.c.b16 %v844_v17, %v843_v16  ;;  %1881 = vtanh.f32 %v640_v14  ;;  %v827_v28 = vunpack.c.l.b16 %v699_v21 }
 0x16e   : > { %v641_v20 = vpop.f32.mrf.mxu2  ;;  %1016 = vmatmul.bf16.gmra.mxu3 %v864_v19 }
 0x16f   : > { %v642_v22 = vadd.f32 %v2401_v32, %v641_v20 }
 0x170   : > { %v599_v23 = vpop.f32.mrf.mxu0 }
 0x171   : > { %v1880_v24 = vpop.eup %1879  ;;  %1883 = vtanh.f32 %v642_v22  ;;  %v600_v25 = vadd.f32 %v2401_v32, %v599_v23 }
 0x172   : > { %v1553_v26 = vpack.c.bf16 %v1880_v24, %v1878_v18  ;;  %v700_v27 = vpack.c.bf16 %v1880_v24, %v1880_v24  ;;  %v1882_v29 = vpop.eup %1881 }
 0x173   : > { %1885 = vtanh.f32 %v600_v25  ;;  %v717_v34 = vpack.c.bf16 %v1882_v29, %v1882_v29 }
 0x174   : > { %1701 = vst [vmem:[%s2411_s17 + $0x38] sm:$0xff] %v1553_v26   ;;  %v828_v30 = vunpack.c.l.b16 %v700_v27 }
 0x175   : > { %v845_v41 = vunpack.c.l.b16 %v717_v34 }
 0x176   : > { %v644_v31 = vpop.f32.mrf.mxu2  ;;  %v856_v33 = vpack.c.b16 %v828_v30, %v827_v28 }
 0x177   : > { %v1884_v35 = vpop.eup %1883  ;;  %v645_v39 = vadd.f32 %v2401_v32, %v644_v31 }
 0x178   : > { %v1598_v36 = vpack.c.bf16 %v1884_v35, %v1882_v29  ;;  %v601_v37 = vpop.f32.mrf.mxu0  ;;  %976 = vmatmul.bf16.gmra.mxu1 %v856_v33  ;;  %v718_v38 = vpack.c.bf16 %v1884_v35, %v1884_v35 }
 0x179   : > { %v602_v40 = vadd.f32 %v2401_v32, %v601_v37  ;;  %v1886_v43 = vpop.eup %1885 }
 0x17a   : > { %1710 = vst [vmem:[%s2411_s17 + $0x80] sm:$0xff] %v1598_v36   ;;  %v846_v42 = vunpack.c.l.b16 %v718_v38  ;;  %v701_v46 = vpack.c.bf16 %v1886_v43, %v1886_v43 }
 0x17b   : > { %1887 = vtanh.f32 %v602_v40 }
 0x17c   : > { %v865_v44 = vpack.c.b16 %v846_v42, %v845_v41  ;;  %1889 = vtanh.f32 %v645_v39  ;;  %v829_v51 = vunpack.c.l.b16 %v701_v46 }
 0x17e   : > { %v646_v45 = vpop.f32.mrf.mxu2  ;;  %1021 = vmatmul.bf16.gmra.mxu3 %v865_v44 }
 0x17f   : > { %v647_v47 = vadd.f32 %v2401_v32, %v646_v45 }
 0x181   : > { %v1888_v48 = vpop.eup %1887  ;;  %1891 = vtanh.f32 %v647_v47 }
 0x182   : > { %v1558_v49 = vpack.c.bf16 %v1888_v48, %v1886_v43  ;;  %v702_v50 = vpack.c.bf16 %v1888_v48, %v1888_v48  ;;  %v1890_v52 = vpop.eup %1889 }
 0x183   : > { %v719_v56 = vpack.c.bf16 %v1890_v52, %v1890_v52 }
 0x184   : > { %1702 = vst [vmem:[%s2411_s17 + $0x40] sm:$0xff] %v1558_v49   ;;  %v830_v53 = vunpack.c.l.b16 %v702_v50 }
 0x185   : > { %v942_v54 = vpop.f32.mrf.mxu1  ;;  %v847_v60 = vunpack.c.l.b16 %v719_v56 }
 0x186   : > { %v857_v55 = vpack.c.b16 %v830_v53, %v829_v51  ;;  %v943_v62 = vadd.f32 %v2464_v58, %v942_v54 }
 0x187   : > { %v1892_v57 = vpop.eup %1891 }
 0x188   : > { %v1603_v59 = vpack.c.bf16 %v1892_v57, %v1890_v52  ;;  %981 = vmatmul.bf16.gmra.mxu1 %v857_v55  ;;  %v720_v32 = vpack.c.bf16 %v1892_v57, %v1892_v57  ;;  %1893 = vtanh.f32 %v943_v62 }
 0x18a   : > { %1711 = vst [vmem:[%s2411_s17 + $0x88] sm:$0xff] %v1603_v59   ;;  %v848_v61 = vunpack.c.l.b16 %v720_v32 }
 0x18c   : > { %v866_v63 = vpack.c.b16 %v848_v61, %v847_v60 }
 0x18d   : > { %v944_v0 = vpop.f32.mrf.mxu1 }
 0x18e   : > { %v945_v1 = vadd.f32 %v2464_v58, %v944_v0  ;;  %1026 = vmatmul.bf16.gmra.mxu3 %v866_v63  ;;  %v1894_v3 = vpop.eup %1893 }
 0x190   : > { %1895 = vtanh.f32 %v945_v1 }
 0x191   : > { %v987_v2 = vpop.f32.mrf.mxu3 }
 0x192   : > { %v988_v7 = vadd.f32 %v2464_v58, %v987_v2 }
 0x194   : > { %1897 = vtanh.f32 %v988_v7 }
 0x195   : > { %v947_v4 = vpop.f32.mrf.mxu1 }
 0x196   : > { %v1896_v5 = vpop.eup %1895  ;;  %v948_v10 = vadd.f32 %v2464_v58, %v947_v4 }
 0x197   : > { %v1608_v6 = vpack.c.bf16 %v1896_v5, %v1894_v3 }
 0x199   : > { %1609 = vst [vmem:[%s2471_s28] sm:$0xff] %v1608_v6   ;;  %v989_v8 = vpop.f32.mrf.mxu3 }
 0x19a   : > { %v990_v9 = vadd.f32 %v2464_v58, %v989_v8  ;;  %v1898_v13 = vpop.eup %1897 }
 0x19c   : > { %1899 = vtanh.f32 %v990_v9 }
 0x19d   : > { %v949_v11 = vpop.f32.mrf.mxu1  ;;  %1901 = vtanh.f32 %v948_v10 }
 0x19e   : > { %v950_v12 = vadd.f32 %v2464_v58, %v949_v11 }
 0x1a0   : > { %1903 = vtanh.f32 %v950_v12 }
 0x1a1   : > { %v992_v14 = vpop.f32.mrf.mxu3 }
 0x1a2   : > { %v1900_v15 = vpop.eup %1899  ;;  %v993_v21 = vadd.f32 %v2464_v58, %v992_v14 }
 0x1a3   : > { %v1653_v16 = vpack.c.bf16 %v1900_v15, %v1898_v13  ;;  %v1902_v17 = vpop.eup %1901 }
 0x1a4   : > { %1905 = vtanh.f32 %v993_v21 }
 0x1a5   : > { %1720 = vst [vmem:[%s2471_s28 + $0x48] sm:$0xff] %v1653_v16   ;;  %v952_v18 = vpop.f32.mrf.mxu1 }
 0x1a6   : > { %v1904_v19 = vpop.eup %1903  ;;  %v953_v24 = vadd.f32 %v2464_v58, %v952_v18 }
 0x1a7   : > { %v1613_v20 = vpack.c.bf16 %v1904_v19, %v1902_v17 }
 0x1a9   : > { %1712 = vst [vmem:[%s2471_s28 + $0x8] sm:$0xff] %v1613_v20   ;;  %v994_v22 = vpop.f32.mrf.mxu3 }
 0x1aa   : > { %v995_v23 = vadd.f32 %v2464_v58, %v994_v22  ;;  %v1906_v27 = vpop.eup %1905 }
 0x1ac   : > { %1907 = vtanh.f32 %v995_v23 }
 0x1ad   : > { %v954_v25 = vpop.f32.mrf.mxu1  ;;  %1909 = vtanh.f32 %v953_v24 }
 0x1ae   : > { %v955_v26 = vadd.f32 %v2464_v58, %v954_v25 }
 0x1b0   : > { %1911 = vtanh.f32 %v955_v26 }
 0x1b1   : > { %v997_v28 = vpop.f32.mrf.mxu3 }
 0x1b2   : > { %v1908_v29 = vpop.eup %1907  ;;  %v998_v36 = vadd.f32 %v2464_v58, %v997_v28 }
 0x1b3   : > { %v1658_v30 = vpack.c.bf16 %v1908_v29, %v1906_v27  ;;  %v1910_v31 = vpop.eup %1909 }
 0x1b4   : > { %1913 = vtanh.f32 %v998_v36 }
 0x1b5   : > { %1721 = vst [vmem:[%s2471_s28 + $0x50] sm:$0xff] %v1658_v30   ;;  %v957_v33 = vpop.f32.mrf.mxu1 }
 0x1b6   : > { %v1912_v34 = vpop.eup %1911  ;;  %v958_v39 = vadd.f32 %v2464_v58, %v957_v33 }
 0x1b7   : > { %v1618_v35 = vpack.c.bf16 %v1912_v34, %v1910_v31 }
 0x1b9   : > { %1713 = vst [vmem:[%s2471_s28 + $0x10] sm:$0xff] %v1618_v35   ;;  %v999_v37 = vpop.f32.mrf.mxu3 }
 0x1ba   : > { %v1000_v38 = vadd.f32 %v2464_v58, %v999_v37  ;;  %v1914_v42 = vpop.eup %1913 }
 0x1bc   : > { %1915 = vtanh.f32 %v1000_v38 }
 0x1bd   : > { %v959_v40 = vpop.f32.mrf.mxu1  ;;  %1917 = vtanh.f32 %v958_v39 }
 0x1be   : > { %v960_v41 = vadd.f32 %v2464_v58, %v959_v40 }
 0x1c0   : > { %1919 = vtanh.f32 %v960_v41 }
 0x1c1   : > { %v1002_v43 = vpop.f32.mrf.mxu3 }
 0x1c2   : > { %v1916_v44 = vpop.eup %1915  ;;  %v1003_v50 = vadd.f32 %v2464_v58, %v1002_v43 }
 0x1c3   : > { %v1663_v45 = vpack.c.bf16 %v1916_v44, %v1914_v42  ;;  %v1918_v46 = vpop.eup %1917 }
 0x1c4   : > { %1921 = vtanh.f32 %v1003_v50 }
 0x1c5   : > { %1722 = vst [vmem:[%s2471_s28 + $0x58] sm:$0xff] %v1663_v45   ;;  %v962_v47 = vpop.f32.mrf.mxu1 }
 0x1c6   : > { %v1920_v48 = vpop.eup %1919  ;;  %v963_v53 = vadd.f32 %v2464_v58, %v962_v47 }
 0x1c7   : > { %v1623_v49 = vpack.c.bf16 %v1920_v48, %v1918_v46 }
 0x1c9   : > { %1714 = vst [vmem:[%s2471_s28 + $0x18] sm:$0xff] %v1623_v49   ;;  %v1004_v51 = vpop.f32.mrf.mxu3 }
 0x1ca   : > { %v1005_v52 = vadd.f32 %v2464_v58, %v1004_v51  ;;  %v1922_v56 = vpop.eup %1921 }
 0x1cc   : > { %1923 = vtanh.f32 %v1005_v52 }
 0x1cd   : > { %v964_v54 = vpop.f32.mrf.mxu1  ;;  %1925 = vtanh.f32 %v963_v53 }
 0x1ce   : > { %v965_v55 = vadd.f32 %v2464_v58, %v964_v54 }
 0x1d0   : > { %1927 = vtanh.f32 %v965_v55 }
 0x1d1   : > { %v1007_v57 = vpop.f32.mrf.mxu3 }
 0x1d2   : > { %v1924_v59 = vpop.eup %1923  ;;  %v1008_v0 = vadd.f32 %v2464_v58, %v1007_v57 }
 0x1d3   : > { %v1668_v32 = vpack.c.bf16 %v1924_v59, %v1922_v56  ;;  %v1926_v60 = vpop.eup %1925 }
 0x1d4   : > { %1929 = vtanh.f32 %v1008_v0 }
 0x1d5   : > { %1723 = vst [vmem:[%s2471_s28 + $0x60] sm:$0xff] %v1668_v32   ;;  %v967_v61 = vpop.f32.mrf.mxu1 }
 0x1d6   : > { %v1928_v62 = vpop.eup %1927  ;;  %v968_v3 = vadd.f32 %v2464_v58, %v967_v61 }
 0x1d7   : > { %v1628_v63 = vpack.c.bf16 %v1928_v62, %v1926_v60 }
 0x1d9   : > { %1715 = vst [vmem:[%s2471_s28 + $0x20] sm:$0xff] %v1628_v63   ;;  %v1009_v1 = vpop.f32.mrf.mxu3 }
 0x1da   : > { %v1010_v2 = vadd.f32 %v2464_v58, %v1009_v1  ;;  %v1930_v6 = vpop.eup %1929 }
 0x1dc   : > { %1931 = vtanh.f32 %v1010_v2 }
 0x1dd   : > { %v969_v4 = vpop.f32.mrf.mxu1  ;;  %1933 = vtanh.f32 %v968_v3 }
 0x1de   : > { %v970_v5 = vadd.f32 %v2464_v58, %v969_v4 }
 0x1e0   : > { %1935 = vtanh.f32 %v970_v5 }
 0x1e1   : > { %v1012_v7 = vpop.f32.mrf.mxu3 }
 0x1e2   : > { %v1932_v8 = vpop.eup %1931  ;;  %v1013_v14 = vadd.f32 %v2464_v58, %v1012_v7 }
 0x1e3   : > { %v1673_v9 = vpack.c.bf16 %v1932_v8, %v1930_v6  ;;  %v1934_v10 = vpop.eup %1933 }
 0x1e4   : > { %1937 = vtanh.f32 %v1013_v14 }
 0x1e5   : > { %1724 = vst [vmem:[%s2471_s28 + $0x68] sm:$0xff] %v1673_v9   ;;  %v972_v11 = vpop.f32.mrf.mxu1 }
 0x1e6   : > { %v1936_v12 = vpop.eup %1935  ;;  %v973_v17 = vadd.f32 %v2464_v58, %v972_v11 }
 0x1e7   : > { %v1633_v13 = vpack.c.bf16 %v1936_v12, %v1934_v10 }
 0x1e9   : > { %1716 = vst [vmem:[%s2471_s28 + $0x28] sm:$0xff] %v1633_v13   ;;  %v1014_v15 = vpop.f32.mrf.mxu3 }
 0x1ea   : > { %v1015_v16 = vadd.f32 %v2464_v58, %v1014_v15  ;;  %v1938_v20 = vpop.eup %1937 }
 0x1ec   : > { %1939 = vtanh.f32 %v1015_v16 }
 0x1ed   : > { %v974_v18 = vpop.f32.mrf.mxu1  ;;  %1941 = vtanh.f32 %v973_v17 }
 0x1ee   : > { %v975_v19 = vadd.f32 %v2464_v58, %v974_v18 }
 0x1f0   : > { %1943 = vtanh.f32 %v975_v19 }
 0x1f1   : > { %v1017_v21 = vpop.f32.mrf.mxu3 }
 0x1f2   : > { %v1940_v22 = vpop.eup %1939  ;;  %v1018_v28 = vadd.f32 %v2464_v58, %v1017_v21 }
 0x1f3   : > { %v1678_v23 = vpack.c.bf16 %v1940_v22, %v1938_v20  ;;  %v1942_v24 = vpop.eup %1941 }
 0x1f4   : > { %1945 = vtanh.f32 %v1018_v28 }
 0x1f5   : > { %1725 = vst [vmem:[%s2471_s28 + $0x70] sm:$0xff] %v1678_v23   ;;  %v977_v25 = vpop.f32.mrf.mxu1 }
 0x1f6   : > { %v1944_v26 = vpop.eup %1943  ;;  %v978_v31 = vadd.f32 %v2464_v58, %v977_v25 }
 0x1f7   : > { %v1638_v27 = vpack.c.bf16 %v1944_v26, %v1942_v24 }
 0x1f9   : > { %1717 = vst [vmem:[%s2471_s28 + $0x30] sm:$0xff] %v1638_v27   ;;  %v1019_v29 = vpop.f32.mrf.mxu3 }
 0x1fa   : > { %v1020_v30 = vadd.f32 %v2464_v58, %v1019_v29  ;;  %v1946_v35 = vpop.eup %1945 }
 0x1fc   : > { %1947 = vtanh.f32 %v1020_v30 }
 0x1fd   : > { %v979_v33 = vpop.f32.mrf.mxu1  ;;  %1949 = vtanh.f32 %v978_v31 }
 0x1fe   : > { %v980_v34 = vadd.f32 %v2464_v58, %v979_v33 }
 0x200   : > { %1951 = vtanh.f32 %v980_v34 }
 0x201   : > { %v1022_v36 = vpop.f32.mrf.mxu3 }
 0x202   : > { %v1948_v37 = vpop.eup %1947  ;;  %v1023_v43 = vadd.f32 %v2464_v58, %v1022_v36 }
 0x203   : > { %v1683_v38 = vpack.c.bf16 %v1948_v37, %v1946_v35  ;;  %v1950_v39 = vpop.eup %1949 }
 0x204   : > { %1953 = vtanh.f32 %v1023_v43 }
 0x205   : > { %1726 = vst [vmem:[%s2471_s28 + $0x78] sm:$0xff] %v1683_v38   ;;  %v982_v40 = vpop.f32.mrf.mxu1 }
 0x206   : > { %v1952_v41 = vpop.eup %1951  ;;  %v983_v46 = vadd.f32 %v2464_v58, %v982_v40 }
 0x207   : > { %v1643_v42 = vpack.c.bf16 %v1952_v41, %v1950_v39 }
 0x209   : > { %1718 = vst [vmem:[%s2471_s28 + $0x38] sm:$0xff] %v1643_v42   ;;  %v1024_v44 = vpop.f32.mrf.mxu3 }
 0x20a   : > { %v1025_v45 = vadd.f32 %v2464_v58, %v1024_v44  ;;  %v1954_v49 = vpop.eup %1953 }
 0x20c   : > { %1955 = vtanh.f32 %v1025_v45 }
 0x20d   : > { %v984_v47 = vpop.f32.mrf.mxu1  ;;  %1957 = vtanh.f32 %v983_v46 }
 0x20e   : > { %v985_v48 = vadd.f32 %v2464_v58, %v984_v47 }
 0x210   : > { %1959 = vtanh.f32 %v985_v48 }
 0x211   : > { %v1027_v50 = vpop.f32.mrf.mxu3 }
 0x212   : > { %v1956_v51 = vpop.eup %1955  ;;  %v1028_v56 = vadd.f32 %v2464_v58, %v1027_v50 }
 0x213   : > { %v1688_v52 = vpack.c.bf16 %v1956_v51, %v1954_v49  ;;  %v1958_v53 = vpop.eup %1957 }
 0x214   : > { %1961 = vtanh.f32 %v1028_v56 }
 0x215   : > { %1727 = vst [vmem:[%s2471_s28 + $0x80] sm:$0xff] %v1688_v52  }
 0x216   : > { %v1960_v54 = vpop.eup %1959 }
 0x217   : > { %v1648_v55 = vpack.c.bf16 %v1960_v54, %v1958_v53 }
 0x219   : > { %1719 = vst [vmem:[%s2471_s28 + $0x40] sm:$0xff] %v1648_v55   ;;  %v1029_v57 = vpop.f32.mrf.mxu3 }
 0x21a   : > { %v1030_v59 = vadd.f32 %v2464_v58, %v1029_v57  ;;  %v1962_v32 = vpop.eup %1961 }
 0x21c   : > { %1963 = vtanh.f32 %v1030_v59 }
 0x221   : > { %1152 = sbr.rel (!%p2290_p11) target bundleno = 582 (0x246), region = 56 }
 0x222   : > { %v1964_v60 = vpop.eup %1963 }
 0x223   : > { %v1693_v61 = vpack.c.bf16 %v1964_v60, %v1962_v32 }
 0x225   : > { %1728 = vst [vmem:[%s2471_s28 + $0x88] sm:$0xff] %v1693_v61  }
 0x226   : > { %s2670_s12 = smov (!%p1155_p6, %s1154_s12), 36 }
 0x227   : > { %s1466_s3 = sshll.u32 %s2670_s12, 2 }
 0x228   : > { %s1158_s20 = ssub.s32 144, %s1466_s3 }
 0x229   : > { %s1159_s18 = sshll.u32 %s1158_s20, 4 }
 0x22a   : > { %1160 = vsyncadd %s1141_s29, %s1159_s18  ;;  %p2534_p13 = scmp.ne.s32.totalorder %s1466_s3, 0  ;;  %s1513_s14 = smul.u32 144, %s2259_s25 }
 0x22b   : > { %s1165_s13 = sshll.u32 %s2411_s17, 4  ;;  %s2641_s26 = sshll.u32 %s2670_s12, 6  ;;  %s2544_s13 = int_to_ptr.vmem [resolvable:$true] %s1165_s13 }
 0x22c   : > { %s1163_s19 = scalar_lea.hbm %s2637_s5, %s1513_s14  ;;  %s2064_s16 = sshra.s32 %s2544_s13, 4  ;;  %s2065_s16 = int_to_ptr.vmem [resolvable:$true] %s2064_s16 }
 0x22d   : > { %s1167_s7 = sshll.u32 %s1163_s19, 4  ;;  %s2066_s3 = sshrl.u32 %s2641_s26, 4  ;;  %s2546_s7 = int_to_ptr.hbm [resolvable:$true] %s1167_s7 }
 0x22e   : > { %s2071_s20 = scalar_lea.vmem %s2065_s16, %s2066_s3  ;;  %s2197_s17 = smov [#allocation8]  }
 0x22f   : > { %p2072_p2 = scmp.ne.s32.totalorder %s2065_s16, %s2071_s20  ;;  %s2075_s18 = scalar_lea.vmem %s2197_s17, 288 }
 0x230   : > { %p2077_p10 = scmp.lt.s32.totalorder %s2075_s18, %s2071_s20 }
 0x231   : > { %p2073_p5 = pnand %p2072_p2, %p2534_p13 }
 0x233   : > { %p2074_p9 = pneg %p2073_p5 }
 0x235   : > { %p2079_p1 = pnand %p2077_p10, %p2074_p9 }
 0x237   : > { %2082 = shalt.err (!%p2079_p1)
}
 0x238   : > { %s2083_s14 = sshra.s32 %s2546_s7, 4  ;;  %s2094_s16 = scalar_lea.hbm %s2637_s5, 152  ;;  %s2084_s14 = int_to_ptr.hbm [resolvable:$true] %s2083_s14 }
 0x239   : > { %s2090_s8 = scalar_lea.hbm %s2084_s14, %s2066_s3  ;;  %p2095_p8 = scmp.lt.s32.totalorder %s2084_s14, %s2637_s5 }
 0x23a   : > { %p2091_p0 = scmp.ne.s32.totalorder %s2084_s14, %s2090_s8  ;;  %p2096_p4 = scmp.lt.s32.totalorder %s2094_s16, %s2090_s8 }
 0x23c   : > { %p2092_p3 = pnand %p2091_p0, %p2534_p13  ;;  %p2097_p12 = por %p2096_p4, %p2095_p8 }
 0x23e   : > { %p2093_p7 = pneg %p2092_p3 }
 0x240   : > { %p2098_p6 = pnand %p2097_p12, %p2093_p7 }
 0x242   : > { %2101 = shalt.err (!%p2098_p6)
}
 0x243   : > { %s2198_s20 = smov 64   ;;  %s2199_s3 = smov 4  }
 0x244   : > { %s2656_s17 = sshll.u32 %s2670_s12, 6 }
 0x245   : > { %1173 = dma.vmem_to_hbm [thread:$0]  (%p2534_p13), %s2544_s13, %s2656_s17, %s2546_s7, %s1141_s29, %s2198_s20, %s2198_s20, %s2199_s3  }
 0x246 PF: > { %1176 = sbr.rel (!%p2290_p11) target bundleno = 620 (0x26c), region = 60  ;;  %s2657_s11 = scalar_lea.sflag (%p2290_p11), [#allocation10], %s2365_s30 }
 0x247   : > { %s1177_s15 = smul.u32 (%p2290_p11), 36, %s2259_s25 }
 0x249   : > { %s1178_s26 = ssub.s32 (%p2290_p11), 38, %s1177_s15 }
 0x24a   : > { %p1179_p2 = scmp.lt.s32.totalorder (%p2290_p11), %s1178_s26, 36 }
 0x24c   : > { %s2672_s26 = smov (!%p1179_p2, %s1178_s26), 36 }
 0x24d   : > { %s1471_s18 = sshll.u32 %s2672_s26, 2 }
 0x24e   : > { %s1182_s14 = ssub.s32 144, %s1471_s18 }
 0x24f   : > { %s1183_s8 = sshll.u32 %s1182_s14, 4 }
 0x250   : > { %1184 = vsyncadd %s2657_s11, %s1183_s8  ;;  %p2578_p13 = scmp.ne.s32.totalorder %s1471_s18, 0  ;;  %s1514_s29 = smul.u32 144, %s2259_s25 }
 0x251   : > { %s1189_s12 = sshll.u32 %s2471_s28, 4  ;;  %s1475_s1 = sshll.u32 %s2672_s26, 6  ;;  %s2588_s12 = int_to_ptr.vmem [resolvable:$true] %s1189_s12 }
 0x252   : > { %s1187_s19 = scalar_lea.hbm %s2638_s6, %s1514_s29  ;;  %s2103_s20 = sshra.s32 %s2588_s12, 4  ;;  %s2104_s20 = int_to_ptr.vmem [resolvable:$true] %s2103_s20 }
 0x253   : > { %s1191_s16 = sshll.u32 %s1187_s19, 4  ;;  %s2105_s3 = sshrl.u32 %s1475_s1, 4  ;;  %s2590_s16 = int_to_ptr.hbm [resolvable:$true] %s1191_s16 }
 0x254   : > { %s2110_s17 = scalar_lea.vmem %s2104_s20, %s2105_s3  ;;  %s2200_s25 = smov [#allocation9]  }
 0x255   : > { %p2111_p11 = scmp.ne.s32.totalorder %s2104_s20, %s2110_s17  ;;  %s2114_s28 = scalar_lea.vmem %s2200_s25, 288 }
 0x256   : > { %p2116_p10 = scmp.lt.s32.totalorder %s2114_s28, %s2110_s17 }
 0x257   : > { %p2112_p5 = pnand %p2111_p11, %p2578_p13 }
 0x259   : > { %p2113_p9 = pneg %p2112_p5 }
 0x25b   : > { %p2118_p1 = pnand %p2116_p10, %p2113_p9 }
 0x25d   : > { %2121 = shalt.err (!%p2118_p1)
}
 0x25e   : > { %s2122_s15 = sshra.s32 %s2590_s16, 4  ;;  %s2133_s11 = scalar_lea.hbm %s2638_s6, 152  ;;  %s2123_s15 = int_to_ptr.hbm [resolvable:$true] %s2122_s15 }
 0x25f   : > { %s2129_s18 = scalar_lea.hbm %s2123_s15, %s2105_s3  ;;  %p2134_p8 = scmp.lt.s32.totalorder %s2123_s15, %s2638_s6 }
 0x260   : > { %p2130_p0 = scmp.ne.s32.totalorder %s2123_s15, %s2129_s18  ;;  %p2135_p4 = scmp.lt.s32.totalorder %s2133_s11, %s2129_s18 }
 0x262   : > { %p2131_p3 = pnand %p2130_p0, %p2578_p13  ;;  %p2136_p12 = por %p2135_p4, %p2134_p8 }
 0x264   : > { %p2132_p7 = pneg %p2131_p3 }
 0x266   : > { %p2137_p6 = pnand %p2136_p12, %p2132_p7 }
 0x268   : > { %2140 = shalt.err (!%p2137_p6)
}
 0x269   : > { %s2201_s7 = smov 64   ;;  %s2202_s19 = smov 4  }
 0x26a   : > { %s2659_s20 = scalar_lea.sflag [#allocation10], %s2365_s30 }
 0x26b   : > { %1197 = dma.vmem_to_hbm [thread:$0]  (%p2578_p13), %s2588_s12, %s1475_s1, %s2590_s16, %s2659_s20, %s2201_s7, %s2201_s7, %s2202_s19  }
 0x26c PF: > { %s1206_s3 = sand.u32 1, %s2176_s21   ;;  %p2660_p2 = scmp.ne.s32.totalorder %s2648_s10, 0 }
 0x26d   : > { %p2661_p11 = scmp.ge.s32.totalorder %s2188_s24, 2  ;;  %s1207_s17 = scalar_lea.sflag [#allocation4], %s1206_s3 }
 0x26f   : > { %p1766_p5 = pnand %p2661_p11, %p2660_p2 }
 0x271   : > { %p1767_p9 = pneg %p1766_p5 }
 0x273   : > { %2167 = dma.done.wait (%p1767_p9), %s1207_s17, 2304  }
 0x274   : > { %2169 = vsyncadd (%p1767_p9), %s1207_s17, 4294964992  ;;  %s1217_s25 = scalar_lea.sflag [#allocation10], %s1206_s3 }
 0x275   : > { %2171 = dma.done.wait (%p1767_p9), %s1217_s25, 2304  }
 0x276   : > { %2173 = vsyncadd (%p1767_p9), %s1217_s25, 4294964992  ;;  %s2662_s30 = sld [smem:[#allocation15_spill]]  ;;  %p24_p13 = scmp.ge.s32.totalorder %s2263_s27, 4  }
 0x277   : > { %s2663_s21 = smov %s2180_s22  ;;  %s2664_s22 = smov %s2184_s23 }
 0x278   : > { %s2666_s24 = smov %s2263_s27  ;;  %26 = sbr.rel (!%p24_p13) target bundleno = 11 (0xb), region = 110 }
 0x27c   : > { %s2665_s23 = smov %s2662_s30 }
 0x27d   :  { %1223 = vsyncpa [#allocation3], 1 }
 0x27e   :  { %1225 = vsyncpa [#allocation3 + $0x1], 1 }
 0x27f   :  { %1226 = vsyncpa [#allocation6], 1 }
 0x280   :  { %1227 = vsyncpa [#allocation4], 1 }
 0x281   :  { %1229 = vsyncpa [#allocation4 + $0x1], 1 }
 0x282   :  { %1230 = vsyncpa [#allocation10], 1 }
 0x283   :  { %1232 = vsyncpa [#allocation10 + $0x1], 1 }

</bundles_post_ra>
